<compile_context>
chip_gen: v6e
topology: v6e:2x2x1
jax: 0.10.0
libtpu: 0.0.40
codegen_flags: <defaults>
</compile_context>

<pallas_src>
import functools

import jax
import jax.numpy as jnp
from jax import lax
from jax.experimental import pallas as pl
from jax.experimental.pallas import tpu as pltpu


def _lorax_kernel(patches_ref, wproj_t_ref, la_ref, lb_t_ref, whead_t_ref,
                  bias_ref, out_ref, pooled_acc, *, inv_num_patches):
    """Fused: mean-pool -> base proj + LoRA low-rank path -> linear head.

    Grid = (batch tiles, patch tiles); the patch axis is the inner reduction.

    patches_ref : (TB, TP, Dp) bf16   im2col'd image patch tile
    wproj_t_ref : (Dp, E)      bf16   base patch-embedding weight, pre-transposed
    la_ref      : (r, Dp)      bf16   LoRA A ('task0'); contracted on last dims
    lb_t_ref    : (r, E)       bf16   LoRA B^T with `scaling` pre-folded
    whead_t_ref : (E, Opad)    bf16   head weight, pre-transposed, lane-padded
    bias_ref    : (1, Opad)    f32    head bias, lane-padded
    out_ref     : (TB, Opad)   f32    logits (padded)
    pooled_acc  : (TB, Dp)     f32    VMEM scratch: pooled-patch accumulator
    """
    p_idx = pl.program_id(1)

    @pl.when(p_idx == 0)
    def _init():
        pooled_acc[...] = jnp.zeros_like(pooled_acc)

    # Accumulate the patch sum for this batch tile in f32 (VPU/XLU only;
    # matmuls happen once per batch tile, on the last patch step).
    pooled_acc[...] += jnp.sum(patches_ref[...].astype(jnp.float32), axis=1)

    @pl.when(p_idx == pl.num_programs(1) - 1)
    def _finalize():
        compute_dt = wproj_t_ref.dtype
        pooled = (pooled_acc[...] * inv_num_patches).astype(compute_dt)  # (TB, Dp)

        # Base path: (TB, Dp) @ (Dp, E) — contraction dim already adjacent.
        feats = jnp.dot(pooled, wproj_t_ref[...],
                        preferred_element_type=jnp.float32)              # (TB, E)

        # LoRA low-rank path, unmerged (scaling folded into lb_t on the host):
        #   mid    = pooled @ A^T   (dot_general on matching last dims, no .T)
        #   feats += mid @ B_scaled^T
        mid = lax.dot_general(pooled, la_ref[...],
                              (((1,), (1,)), ((), ())),
                              preferred_element_type=jnp.float32)        # (TB, r)
        feats = feats + jnp.dot(mid.astype(compute_dt), lb_t_ref[...],
                                preferred_element_type=jnp.float32)      # (TB, E)

        # SimpleLinear head: feats @ W_head^T + b  (epilogue stays f32).
        logits = jnp.dot(feats.astype(compute_dt), whead_t_ref[...],
                         preferred_element_type=jnp.float32) + bias_ref[...]
        out_ref[...] = logits.astype(out_ref.dtype)


def lorax_forward(x_nchw, w_proj, lora_a, lora_b, w_head, b_head, *,
                  patch_size, scaling, batch_tile=8, patch_tile=8,
                  compute_dtype=jnp.bfloat16):
    """Host wrapper: im2col + weight-layout plumbing in JAX, compute in Pallas."""
    B, C, H, W = x_nchw.shape
    ps = patch_size
    ph, pw = H // ps, W // ps
    P = ph * pw
    Dp = C * ps * ps
    E = w_proj.shape[0]
    O = w_head.shape[0]
    r = lora_a.shape[0]

    # Tile sizes: keep the (sublane, lane) dims of every block a multiple of
    # (8, 128) or equal to the full dim.  Tiny blocks here; at real ConViT
    # sizes, keep the patches block <= ~8-16 MiB so double-buffered inputs fit
    # v7x's 64 MiB VMEM.
    TB = batch_tile if B % batch_tile == 0 else B
    TP = patch_tile if (P % patch_tile == 0 and patch_tile % 8 == 0) else P

    # Lane-pad the head so the output block's last dim is a dense 128-multiple.
    O_pad = max(128, ((O + 127) // 128) * 128)

    # im2col for the non-overlapping patch-embedding conv (kernel = stride = ps).
    patches = (x_nchw
               .reshape(B, C, ph, ps, pw, ps)
               .transpose(0, 2, 4, 1, 3, 5)            # (B, ph, pw, C, ps, ps)
               .reshape(B, P, Dp)
               .astype(compute_dtype))

    # One-time host-side layout plumbing: pre-transpose so contraction dims are
    # adjacent, fold `scaling` into LoRA B, pad the head to O_pad lanes.
    wproj_t = w_proj.T.astype(compute_dtype)                            # (Dp, E)
    la = lora_a.astype(compute_dtype)                                   # (r, Dp)
    lb_t = (scaling * lora_b).T.astype(compute_dtype)                   # (r, E)
    whead_t = jnp.zeros((E, O_pad), compute_dtype).at[:, :O].set(
        w_head.T.astype(compute_dtype))                                 # (E, O_pad)
    bias = jnp.zeros((1, O_pad), jnp.float32).at[0, :O].set(
        b_head.astype(jnp.float32))                                     # (1, O_pad)

    kernel = functools.partial(_lorax_kernel, inv_num_patches=1.0 / P)

    out_padded = pl.pallas_call(
        kernel,
        out_shape=jax.ShapeDtypeStruct((B, O_pad), jnp.float32),
        grid_spec=pltpu.PrefetchScalarGridSpec(
            num_scalar_prefetch=0,
            grid=(B // TB, P // TP),
            in_specs=[
                pl.BlockSpec((TB, TP, Dp), lambda b, p: (b, p, 0)),
                pl.BlockSpec((Dp, E),      lambda b, p: (0, 0)),
                pl.BlockSpec((r, Dp),      lambda b, p: (0, 0)),
                pl.BlockSpec((r, E),       lambda b, p: (0, 0)),
                pl.BlockSpec((E, O_pad),   lambda b, p: (0, 0)),
                pl.BlockSpec((1, O_pad),   lambda b, p: (0, 0)),
            ],
            out_specs=pl.BlockSpec((TB, O_pad), lambda b, p: (b, 0)),
            scratch_shapes=[pltpu.VMEM((TB, Dp), jnp.float32)],
        ),
        compiler_params=pltpu.CompilerParams(
            dimension_semantics=("parallel", "arbitrary"),
            vmem_limit_bytes=32 * 1024 * 1024,
        ),
    )(patches, wproj_t, la, lb_t, whead_t, bias)

    return out_padded[:, :O]


if __name__ == "__main__":
    # Small, deterministic synthetic configuration — sized so the kernel runs a
    # real 2x2 grid (2 batch tiles x 2 patch tiles) instead of a monolith.
    B, C, H, W = 16, 4, 32, 32       # input images, NCHW
    ps = 8                           # patch size -> P = 16 patches
    E = 128                          # backbone embed_dim (lane-aligned)
    O = 10                           # out_dim (number of classes)
    r = 4                            # LoRA rank
    lora_alpha = 8.0
    scaling = lora_alpha / r         # = 2.0

    key = jax.random.PRNGKey(0)
    k_x, k_w, k_a, k_b, k_h = jax.random.split(key, 5)

    Dp = C * ps * ps
    P = (H // ps) * (W // ps)
    x = jax.random.normal(k_x, (B, C, H, W), jnp.float32)

    # Backbone patch-embedding weight (synthetic stand-in for ConViT).
    w_proj = 0.02 * jax.random.normal(k_w, (E, Dp), jnp.float32)

    # LoRA adapter 'task0' weights.
    lora_a = jax.random.normal(k_a, (r, Dp), jnp.float32) / jnp.sqrt(Dp)
    # TODO(synk): peft initializes lora_B to zeros; small random values here so
    # the LoRA path is numerically exercised by the check below.
    lora_b = 0.02 * jax.random.normal(k_b, (E, r), jnp.float32)

    # SimpleLinear head: kaiming_uniform_(nonlinearity='linear'), bias = 0.
    bound = (3.0 / E) ** 0.5
    w_head = jax.random.uniform(k_h, (O, E), jnp.float32, minval=-bound, maxval=bound)
    b_head = jnp.zeros((O,), jnp.float32)

    logits = lorax_forward(x, w_proj, lora_a, lora_b, w_head, b_head,
                           patch_size=ps, scaling=scaling)
    jax.block_until_ready(logits)
    assert logits.shape == (B, O) and logits.dtype == jnp.float32

    # --- Reference 1: mirror the kernel's bf16-input / f32-accumulate math. ---
    patches_bf16 = (x.reshape(B, C, H // ps, ps, W // ps, ps)
                      .transpose(0, 2, 4, 1, 3, 5)
                      .reshape(B, P, Dp)).astype(jnp.bfloat16)
    pooled = jnp.mean(patches_bf16.astype(jnp.float32), axis=1).astype(jnp.bfloat16)
    feats = jnp.dot(pooled, w_proj.T.astype(jnp.bfloat16),
                    preferred_element_type=jnp.float32)
    mid = jnp.dot(pooled, lora_a.astype(jnp.bfloat16).T,
                  preferred_element_type=jnp.float32)
    feats = feats + jnp.dot(mid.astype(jnp.bfloat16),
                            (scaling * lora_b).T.astype(jnp.bfloat16),
                            preferred_element_type=jnp.float32)
    logits_ref = jnp.dot(feats.astype(jnp.bfloat16), w_head.T.astype(jnp.bfloat16),
                         preferred_element_type=jnp.float32) + b_head
    assert jnp.allclose(logits, logits_ref, atol=2e-3, rtol=2e-3)

    # --- Reference 2: full-f32 module math (merged W_eff); loose tolerance
    # accounts only for bf16 quantization of the MXU inputs. ---
    patches_f32 = (x.reshape(B, C, H // ps, ps, W // ps, ps)
                     .transpose(0, 2, 4, 1, 3, 5)
                     .reshape(B, P, Dp))
    w_eff = w_proj + scaling * (lora_b @ lora_a)
    feats_f32 = jnp.einsum('bpd,ed->be', patches_f32, w_eff) / P
    logits_f32 = feats_f32 @ w_head.T + b_head
    assert jnp.allclose(logits, logits_f32, atol=5e-2, rtol=5e-2)

    print("KERNEL_OK")
</pallas_src>

<mosaic_0001>
module attributes {stable_mosaic.version = 11 : i64} {
  func.func @_lorax_kernel(%arg0: i32, %arg1: i32, %arg2: memref<8x8x256xbf16, #tpu.memory_space<vmem>>, %arg3: memref<256x128xbf16, #tpu.memory_space<vmem>>, %arg4: memref<4x256xbf16, #tpu.memory_space<vmem>>, %arg5: memref<4x128xbf16, #tpu.memory_space<vmem>>, %arg6: memref<128x128xbf16, #tpu.memory_space<vmem>>, %arg7: memref<1x128xf32, #tpu.memory_space<vmem>>, %arg8: memref<8x128xf32, #tpu.memory_space<vmem>>, %arg9: memref<8x256xf32, #tpu.memory_space<vmem>>) attributes {dimension_semantics = [#tpu.dimension_semantics<parallel>, #tpu.dimension_semantics<arbitrary>], iteration_bounds = array<i64: 2, 2>, scalar_prefetch = 0 : i64, scratch_operands = 1 : i64, tpu.core_type = #tpu.core_type<tc>, window_params = [{transform_indices = @transform_0, window_bounds = array<i64: 8, 8, 256>}, {pipeline_mode = #tpu.pipeline_mode<synchronous>, transform_indices = @transform_1, window_bounds = array<i64: 256, 128>}, {pipeline_mode = #tpu.pipeline_mode<synchronous>, transform_indices = @transform_2, window_bounds = array<i64: 4, 256>}, {pipeline_mode = #tpu.pipeline_mode<synchronous>, transform_indices = @transform_3, window_bounds = array<i64: 4, 128>}, {pipeline_mode = #tpu.pipeline_mode<synchronous>, transform_indices = @transform_4, window_bounds = array<i64: 128, 128>}, {pipeline_mode = #tpu.pipeline_mode<synchronous>, transform_indices = @transform_5, window_bounds = array<i64: 1, 128>}, {transform_indices = @transform_6, window_bounds = array<i64: 8, 128>}]} {
    %c0_i32 = arith.constant 0 : i32
    %0 = arith.cmpi eq, %arg1, %c0_i32 : i32
    %1 = arith.extui %0 : i1 to i32
    %c0_i32_0 = arith.constant 0 : i32
    %2 = arith.cmpi ne, %1, %c0_i32_0 : i32
    scf.if %2 {
      %cst_8 = arith.constant 0.000000e+00 : f32
      %12 = vector.broadcast %cst_8 : f32 to vector<8x256xf32>
      %c0_9 = arith.constant 0 : index
      %c0_10 = arith.constant 0 : index
      %13 = vector.load %arg9[%c0_9, %c0_10] : memref<8x256xf32, #tpu.memory_space<vmem>>, vector<8x256xf32>
      tpu.vector_store %arg9[%c0_9, %c0_10], %12 {strides = array<i32>} : memref<8x256xf32, #tpu.memory_space<vmem>>, vector<8x256xf32>,
    } else {
    }
    %c0 = arith.constant 0 : index
    %c0_1 = arith.constant 0 : index
    %3 = vector.load %arg9[%c0, %c0_1] : memref<8x256xf32, #tpu.memory_space<vmem>>, vector<8x256xf32>
    %c0_2 = arith.constant 0 : index
    %c0_3 = arith.constant 0 : index
    %c0_4 = arith.constant 0 : index
    %4 = vector.load %arg2[%c0_2, %c0_3, %c0_4] : memref<8x8x256xbf16, #tpu.memory_space<vmem>>, vector<8x8x256xbf16>
    %5 = arith.extf %4 : vector<8x8x256xbf16> to vector<8x8x256xf32>
    %cst = arith.constant dense<0.000000e+00> : vector<8x256xf32>
    %6 = vector.multi_reduction <add>, %5, %cst [1] : vector<8x8x256xf32> to vector<8x256xf32>
    %7 = arith.addf %3, %6 : vector<8x256xf32>
    %c0_5 = arith.constant 0 : index
    %c0_6 = arith.constant 0 : index
    %8 = vector.load %arg9[%c0_5, %c0_6] : memref<8x256xf32, #tpu.memory_space<vmem>>, vector<8x256xf32>
    tpu.vector_store %arg9[%c0_5, %c0_6], %7 {strides = array<i32>} : memref<8x256xf32, #tpu.memory_space<vmem>>, vector<8x256xf32>,
    %c1_i32 = arith.constant 1 : i32
    %9 = arith.cmpi eq, %arg1, %c1_i32 : i32
    %10 = arith.extui %9 : i1 to i32
    %c0_i32_7 = arith.constant 0 : i32
    %11 = arith.cmpi ne, %10, %c0_i32_7 : i32
    scf.if %11 {
      %c0_8 = arith.constant 0 : index
      %c0_9 = arith.constant 0 : index
      %12 = vector.load %arg9[%c0_8, %c0_9] : memref<8x256xf32, #tpu.memory_space<vmem>>, vector<8x256xf32>
      %cst_10 = arith.constant 6.250000e-02 : f32
      %13 = vector.broadcast %cst_10 : f32 to vector<8x256xf32>
      %14 = arith.mulf %12, %13 : vector<8x256xf32>
      %15 = arith.truncf %14 : vector<8x256xf32> to vector<8x256xbf16>
      %c0_11 = arith.constant 0 : index
      %c0_12 = arith.constant 0 : index
      %16 = vector.load %arg3[%c0_11, %c0_12] : memref<256x128xbf16, #tpu.memory_space<vmem>>, vector<256x128xbf16>
      %cst_13 = arith.constant dense<0.000000e+00> : vector<8x128xf32>
      %17 = tpu.matmul %15, %16, %cst_13 {dimension_numbers = #tpu.dot_dimension_numbers<[1], [0], [0], [1], [0, 0, 1, 1], [], []>} : vector<8x256xbf16>, vector<256x128xbf16>, vector<8x128xf32> -> vector<8x128xf32>
      %c0_14 = arith.constant 0 : index
      %c0_15 = arith.constant 0 : index
      %18 = vector.load %arg4[%c0_14, %c0_15] : memref<4x256xbf16, #tpu.memory_space<vmem>>, vector<4x256xbf16>
      %cst_16 = arith.constant dense<0.000000e+00> : vector<8x4xf32>
      %19 = tpu.matmul %15, %18, %cst_16 {dimension_numbers = #tpu.dot_dimension_numbers<[1], [1], [0], [0], [0, 0, 1, 0], [], []>} : vector<8x256xbf16>, vector<4x256xbf16>, vector<8x4xf32> -> vector<8x4xf32>
      %20 = arith.truncf %19 : vector<8x4xf32> to vector<8x4xbf16>
      %c0_17 = arith.constant 0 : index
      %c0_18 = arith.constant 0 : index
      %21 = vector.load %arg5[%c0_17, %c0_18] : memref<4x128xbf16, #tpu.memory_space<vmem>>, vector<4x128xbf16>
      %cst_19 = arith.constant dense<0.000000e+00> : vector<8x128xf32>
      %22 = tpu.matmul %20, %21, %cst_19 {dimension_numbers = #tpu.dot_dimension_numbers<[1], [0], [0], [1], [0, 0, 1, 1], [], []>} : vector<8x4xbf16>, vector<4x128xbf16>, vector<8x128xf32> -> vector<8x128xf32>
      %23 = arith.addf %17, %22 : vector<8x128xf32>
      %24 = arith.truncf %23 : vector<8x128xf32> to vector<8x128xbf16>
      %c0_20 = arith.constant 0 : index
      %c0_21 = arith.constant 0 : index
      %25 = vector.load %arg6[%c0_20, %c0_21] : memref<128x128xbf16, #tpu.memory_space<vmem>>, vector<128x128xbf16>
      %cst_22 = arith.constant dense<0.000000e+00> : vector<8x128xf32>
      %26 = tpu.matmul %24, %25, %cst_22 {dimension_numbers = #tpu.dot_dimension_numbers<[1], [0], [0], [1], [0, 0, 1, 1], [], []>} : vector<8x128xbf16>, vector<128x128xbf16>, vector<8x128xf32> -> vector<8x128xf32>
      %c0_23 = arith.constant 0 : index
      %c0_24 = arith.constant 0 : index
      %27 = vector.load %arg7[%c0_23, %c0_24] : memref<1x128xf32, #tpu.memory_space<vmem>>, vector<1x128xf32>
      %28 = vector.broadcast %27 : vector<1x128xf32> to vector<8x128xf32>
      %29 = arith.addf %26, %28 : vector<8x128xf32>
      %c0_25 = arith.constant 0 : index
      %c0_26 = arith.constant 0 : index
      %30 = vector.load %arg8[%c0_25, %c0_26] : memref<8x128xf32, #tpu.memory_space<vmem>>, vector<8x128xf32>
      tpu.vector_store %arg8[%c0_25, %c0_26], %29 {strides = array<i32>} : memref<8x128xf32, #tpu.memory_space<vmem>>, vector<8x128xf32>,
    } else {
    }
    return
  }
  func.func @transform_0(%arg0: i32, %arg1: i32) -> (i32, i32, i32) {
    %c0_i32 = arith.constant 0 : i32
    %c0_i32_0 = arith.constant 0 : i32
    return %arg0, %arg1, %c0_i32 : i32, i32, i32
  }
  func.func @transform_1(%arg0: i32, %arg1: i32) -> (i32, i32) {
    %c0_i32 = arith.constant 0 : i32
    %c0_i32_0 = arith.constant 0 : i32
    %c0_i32_1 = arith.constant 0 : i32
    return %c0_i32, %c0_i32_0 : i32, i32
  }
  func.func @transform_2(%arg0: i32, %arg1: i32) -> (i32, i32) {
    %c0_i32 = arith.constant 0 : i32
    %c0_i32_0 = arith.constant 0 : i32
    %c0_i32_1 = arith.constant 0 : i32
    return %c0_i32, %c0_i32_0 : i32, i32
  }
  func.func @transform_3(%arg0: i32, %arg1: i32) -> (i32, i32) {
    %c0_i32 = arith.constant 0 : i32
    %c0_i32_0 = arith.constant 0 : i32
    %c0_i32_1 = arith.constant 0 : i32
    return %c0_i32, %c0_i32_0 : i32, i32
  }
  func.func @transform_4(%arg0: i32, %arg1: i32) -> (i32, i32) {
    %c0_i32 = arith.constant 0 : i32
    %c0_i32_0 = arith.constant 0 : i32
    %c0_i32_1 = arith.constant 0 : i32
    return %c0_i32, %c0_i32_0 : i32, i32
  }
  func.func @transform_5(%arg0: i32, %arg1: i32) -> (i32, i32) {
    %c0_i32 = arith.constant 0 : i32
    %c0_i32_0 = arith.constant 0 : i32
    %c0_i32_1 = arith.constant 0 : i32
    return %c0_i32, %c0_i32_0 : i32, i32
  }
  func.func @transform_6(%arg0: i32, %arg1: i32) -> (i32, i32) {
    %c0_i32 = arith.constant 0 : i32
    %c0_i32_0 = arith.constant 0 : i32
    return %arg0, %c0_i32 : i32, i32
  }
}

</mosaic_0001>

<bundles_post_ra>
// kernel: tpu_custom_call.1
= control target key start
LH: loop header
LB: loop body
LE: loop exit
PB: predicated region body
PF: predicated region fallthrough
CT: control target
= control target key end

     0   :  { %s1899_s0 = inlined_call_operand.hbm [shape: bf16[16,16,256], index: 0, kind: input, shape index: {}]   ;;  %s1900_s1 = inlined_call_operand.hbm [shape: bf16[256,128], index: 1, kind: input, shape index: {}]   ;;  %s1901_s2 = inlined_call_operand.hbm [shape: bf16[4,256], index: 2, kind: input, shape index: {}]   ;;  %s1902_s3 = inlined_call_operand.vmem [shape: bf16[4,128], index: 3, kind: input, shape index: {}]   ;;  %s1903_s4 = inlined_call_operand.hbm [shape: bf16[128,128], index: 4, kind: input, shape index: {}]   ;;  %s1904_s5 = inlined_call_operand.vmem [shape: f32[1,128], index: 5, kind: input, shape index: {}]   ;;  %s1905_s6 = inlined_call_operand.hbm [shape: f32[16,128], index: 6, kind: output, shape index: {}]  }
   0x1   :  { %1919 = sst [smem:[#allocation22_spill]] %s1900_s1 }
   0x2   :  { %1920 = sst [smem:[#allocation23_spill]] %s1901_s2 }
   0x3   :  { %1921 = sst [smem:[#allocation24_spill]] %s1903_s4 }
   0x4   :  { %1922 = sst [smem:[#allocation25_spill]] %s1905_s6 }
   0x5   :  { %11 = vsyncpa [#allocation4], 0 }
   0x6   :  { %13 = vsyncpa [#allocation4 + $0x1], 0 }
   0x7   :  { %14 = vsyncpa [#allocation7], 0 }
   0x8   :  { %15 = vsyncpa [#allocation10], 0 }
   0x9   :  { %16 = vsyncpa [#allocation5], 0 }
   0xa   :  { %18 = vsyncpa [#allocation5 + $0x1], 0  ;;  %s1582_s21 = smov 0   ;;  %s1584_s22 = smov 0  }
   0xb   :  { %s1586_s23 = smov 0   ;;  %s1588_s24 = smov 0  }
   0xc   :  { %s1590_s25 = smov 0   ;;  %s1592_s26 = smov 0  }
   0xd   :  { %s1594_s27 = smov 0   ;;  %s1596_s28 = smov 0  }
   0xe   :  { %s1598_s29 = smov 0   ;;  %s1600_s30 = smov 0  }
   0xf   :  { %s1602_s7 = smov 0  }
  0x10 LB: > { %1923 = sst [smem:[#allocation16_spill]] %s1492_s21  ;;  %s1022_s8 = sadd.s32 4294967295, %s1532_s7   ;;  %s1532_s7 = sphi %s1602_s7, %s24_s7   ;;  %s1528_s30 = sphi %s1600_s30, %s1960_s30   ;;  %s1524_s29 = sphi %s1598_s29, %s1952_s29   ;;  %s1520_s28 = sphi %s1596_s28, %s1959_s28   ;;  %s1516_s27 = sphi %s1594_s27, %s1951_s27   ;;  %s1512_s26 = sphi %s1592_s26, %s1958_s26   ;;  %s1508_s25 = sphi %s1590_s25, %s1957_s25   ;;  %s1504_s24 = sphi %s1588_s24, %s1956_s24   ;;  %s1500_s23 = sphi %s1586_s23, %s1955_s23   ;;  %s1496_s22 = sphi %s1584_s22, %s1954_s22   ;;  %s1492_s21 = sphi %s1582_s21, %s1953_s21  }
  0x11   : > { %1924 = sst [smem:[#allocation17_spill]] %s1524_s29  ;;  %s1023_s9 = sadd.s32 4294967294, %s1532_s7  }
  0x12   : > { %1925 = sst [smem:[#allocation18_spill]] %s1532_s7  ;;  %p52_p0 = scmp.ne.s32.totalorder %s1512_s26, %s1508_s25 }
  0x13   : > { %p53_p1 = scmp.eq.s32.totalorder %s1532_s7, 0  ;;  %p58_p2 = scmp.ne.s32.totalorder %s1508_s25, %s1504_s24 }
  0x14   : > { %p1642_p3 = scmp.eq.s32.totalorder %s1022_s8, 0  ;;  %p186_p5 = scmp.ne.s32.totalorder %s1500_s23, %s1496_s22 }
  0x15   : > { %p1647_p4 = por %p53_p1, %p52_p0  ;;  %p187_p7 = scmp.eq.s32.totalorder %s1022_s8, 3 }
  0x16   : > { %s1926_s11 = scalar_select %p1642_p3, 1, 0 }
  0x17   : > { %p1655_p6 = por %p1642_p3, %p58_p2  ;;  %p192_p8 = scmp.ne.s32.totalorder %s1496_s22, %s1492_s21 }
  0x18   : > { %p193_p9 = scmp.eq.s32.totalorder %s1023_s9, 3  ;;  %p1661_p10 = por %p187_p7, %p186_p5 }
  0x19   : > { %s1928_s14 = scalar_select %p1655_p6, 1, 0 }
  0x1a   : > { %s1929_s15 = scalar_select %p1661_p10, 1, 0 }
  0x1b   : > { %p1024_p11 = scmp.ge.s32.totalorder %s1532_s7, 1  ;;  %p1666_p12 = por %p193_p9, %p192_p8 }
  0x1c   : > { %1930 = sst [smem:[#allocation19_spill]] %s1929_s15  ;;  %p200_p13 = scmp.lt.s32.totalorder %s1532_s7, 5 }
  0x1d   : > { %s1931_s16 = scalar_select %p1666_p12, 1, 0 }
  0x1e   : > { %p1671_p0 = pnand %p1024_p11, %p200_p13  ;;  %s1534_s18 = smov [#allocation6]  }
  0x1f   : > { %1932 = sst [smem:[#allocation20_spill]] %s1931_s16  ;;  %s212_s19 = sshll.u32 %s1534_s18, 4  ;;  %s213_s19 = int_to_ptr.vmem [resolvable:$true] %s212_s19 }
  0x20   : > { %p1149_p1 = pneg %p1671_p0  ;;  %p1170_p2 = scmp.lt.s32.totalorder %s1532_s7, 4 }
  0x21   : > { %s1535_s8 = smov [#allocation8]   ;;  %s1309_s18 = scalar_lea.vmem %s213_s19, 2048 }
  0x22   : > { %p1680_p5 = pnand %p1149_p1, %p1642_p3  ;;  %p1686_p7 = pnand %p1170_p2, %p1647_p4 }
  0x23   : > { %s226_s9 = sshll.u32 %s1535_s8, 4  ;;  %p1310_p9 = scmp.ne.s32.totalorder %s213_s19, %s1309_s18  ;;  %s227_s9 = int_to_ptr.vmem [resolvable:$true] %s226_s9 }
  0x24   : > { %p1300_p8 = pneg %p1680_p5  ;;  %p1317_p1 = scmp.lt.s32.totalorder %s213_s19, %s213_s19 }
  0x25   : > { %p1318_p12 = scmp.lt.s32.totalorder %s1309_s18, %s1309_s18 }
  0x26   : > { %p1312_p11 = pnand %p1310_p9, %p1300_p8 }
  0x27   : > { %p1319_p10 = por %p1318_p12, %p1317_p1 }
  0x28   : > { %p1313_p13 = pneg %p1312_p11 }
  0x2a   : > { %p1320_p3 = pnand %p1319_p10, %p1313_p13 }
  0x2c   : > { %1323 = shalt.err (!%p1320_p3)
}
  0x2d   : > { %s1536_s13 = smov 64   ;;  %s1537_s10 = smov 4  }
  0x2e   : > { %s1936_s1 = sld [smem:[#allocation22_spill]]  ;;  %s1335_s16 = scalar_lea.vmem %s227_s9, 64 }
  0x2f   : > { %p1336_p4 = scmp.ne.s32.totalorder %s227_s9, %s1335_s16  ;;  %p1343_p11 = scmp.lt.s32.totalorder %s227_s9, %s227_s9 }
  0x30   : > { %p1344_p6 = scmp.lt.s32.totalorder %s1335_s16, %s1335_s16 }
  0x31   : > { %p1338_p2 = pnand %p1336_p4, %p1300_p8 }
  0x32   : > { %p1345_p12 = por %p1344_p6, %p1343_p11 }
  0x33   : > { %p1339_p9 = pneg %p1338_p2 }
  0x34   : > { %1152 = dma.hbm_to_vmem [thread:$0]  (!%p1680_p5), %s1936_s1, 2048, %s213_s19, [#allocation7], %s1536_s13, %s1536_s13, %s1537_s10  }
  0x35   : > { %p1346_p10 = pnand %p1345_p12, %p1339_p9 }
  0x37   : > { %1349 = shalt.err (!%p1346_p10)
}
  0x38   : > { %s1937_s2 = sld [smem:[#allocation23_spill]]  ;;  %s1538_s12 = smov [#allocation9]  }
  0x39   : > { %s239_s19 = sshll.u32 %s1538_s12, 4  ;;  %s240_s19 = int_to_ptr.vmem [resolvable:$true] %s239_s19 }
  0x3a   : > { %s1361_s8 = scalar_lea.vmem %s240_s19, 1024  ;;  %p1369_p4 = scmp.lt.s32.totalorder %s240_s19, %s240_s19 }
  0x3b   : > { %p1362_p3 = scmp.ne.s32.totalorder %s240_s19, %s1361_s8  ;;  %p1370_p6 = scmp.lt.s32.totalorder %s1361_s8, %s1361_s8 }
  0x3d   : > { %p1364_p13 = pnand %p1362_p3, %p1300_p8  ;;  %p1371_p2 = por %p1370_p6, %p1369_p4 }
  0x3e   : > { %1155 = dma.hbm_to_vmem [thread:$0]  (!%p1680_p5), %s1937_s2, 64, %s227_s9, [#allocation7]  }
  0x3f   : > { %p1365_p1 = pneg %p1364_p13 }
  0x41   : > { %p1372_p9 = pnand %p1371_p2, %p1365_p1 }
  0x43   : > { %1375 = shalt.err (!%p1372_p9)
}
  0x44   : > { %s1938_s4 = sld [smem:[#allocation24_spill]]  ;;  %s33_s9 = sadd.s32 1, %s1524_s29 }
  0x45   : > { %s36_s18 = sadd.s32 1, %s1528_s30  ;;  %p34_p8 = scmp.ge.s32.totalorder %s33_s9, 2 }
  0x46   : > { %s256_s12 = sand.u32 1, %s1512_s26   ;;  %s1031_s16 = sshll.u32 %s1524_s29, 1 }
  0x47   : > { %s1029_s8 = sshll.u32 %s256_s12, 6  ;;  %s1962_s9 = smov (%p34_p8, %s33_s9), 0 }
  0x48   : > { %1939 = sst [smem:[#allocation21_spill]] %s1962_s9  ;;  %s1964_s18 = smov (!%p34_p8, %s36_s18), %s1528_s30 }
  0x49   : > { %s41_s20 = ssub.s32 %s1524_s29, %s1962_s9  ;;  %p38_p11 = scmp.ge.s32.totalorder %s1964_s18, 2 }
  0x4a   : > { %1158 = dma.hbm_to_vmem [thread:$0]  (!%p1680_p5), %s1938_s4, 1024, %s240_s19, [#allocation10], %s1536_s13, %s1536_s13, %s1537_s10  }
  0x4b   : > { %s1073_s21 = sshll.u32 %s1528_s30, 5  ;;  %s260_s10 = scalar_lea.vmem [#allocation3], %s1029_s8 }
  0x4c   : > { %s270_s13 = sshll.u32 %s260_s10, 4  ;;  %s1966_s18 = smov (%p38_p11, %s1964_s18), 0  ;;  %s1728_s13 = int_to_ptr.vmem [resolvable:$true] %s270_s13 }
  0x4d   : > { %s267_s19 = sadd.s32 %s1073_s21, %s1031_s16  ;;  %s40_s1 = ssub.s32 %s1528_s30, %s1966_s18 }
  0x4e   : > { %s1033_s2 = sshll.u32 %s267_s19, 6  ;;  %s42_s4 = sor.u32 %s41_s20, %s40_s1 }
  0x4f   : > { %p174_p5 = scmp.eq.s32.totalorder %s40_s1, 0  ;;  %p43_p12 = scmp.eq.s32.totalorder %s42_s4, 0 }
  0x50   : > { %s269_s7 = scalar_lea.hbm %s1899_s0, %s1033_s2  ;;  %s1940_s8 = sadd.s32 1, %s1500_s23 }
  0x51   : > { %s1738_s10 = scalar_select %p174_p5, %s1500_s23, %s1940_s8  }
  0x52   : > { %s1941_s6 = sadd.s32 1, %s1512_s26  ;;  %s257_s16 = scalar_lea.sflag [#allocation4], %s256_s12 }
  0x53   : > { %s1743_s15 = scalar_select %p43_p12, %s1512_s26, %s1941_s6  }
  0x54   : > { %p1378_p10 = pneg %p1686_p7  ;;  %s1389_s21 = scalar_lea.vmem %s1728_s13, 1024 }
  0x55   : > { %p1390_p3 = scmp.ne.s32.totalorder %s1728_s13, %s1389_s21  ;;  %s1539_s20 = smov [#allocation3]  }
  0x56   : > { %s1394_s1 = sshll.u32 %s1539_s20, 4  ;;  %s1395_s1 = int_to_ptr.vmem [resolvable:$false] %s1394_s1 }
  0x57   : > { %p1392_p13 = pnand %p1390_p3, %p1378_p10  ;;  %s1396_s4 = scalar_lea.vmem %s1395_s1, 2048 }
  0x58   : > { %p1397_p4 = scmp.lt.s32.totalorder %s1728_s13, %s1395_s1  ;;  %p1398_p6 = scmp.lt.s32.totalorder %s1396_s4, %s1389_s21 }
  0x59   : > { %p1393_p1 = pneg %p1392_p13 }
  0x5a   : > { %p1399_p2 = por %p1398_p6, %p1397_p4 }
  0x5c   : > { %p1400_p9 = pnand %p1399_p2, %p1393_p1 }
  0x5e   : > { %1403 = shalt.err (!%p1400_p9)
}
  0x5f   : > { %s1540_s2 = smov 256   ;;  %s1541_s6 = smov 128  }
  0x60   : > { %s1542_s29 = smov 8   ;;  %282 = sbr.rel (%p1671_p0) target bundleno = 820 (0x334), region = 44 }
  0x61   : > { %1162 = dma.hbm_to_vmem [thread:$0]  (!%p1686_p7), %s269_s7, 1024, %s1728_s13, %s257_s16, %s1540_s2, %s1541_s6, %s1542_s29  }
  0x62   : > { %s284_s9 = sand.u32 (!%p1671_p0), 1, %s1508_s25   ;;  %p1942_p8 = scmp.ne.s32.totalorder (!%p1671_p0), %s1928_s14, 0 }
  0x63   : > { %s1035_s12 = sshll.u32 (!%p1671_p0), %s284_s9, 6  ;;  %s285_s19 = scalar_lea.sflag (!%p1671_p0), [#allocation4], %s284_s9 }
  0x64   : > { %s1756_s8 = scalar_lea.vmem (!%p1671_p0), [#allocation3], %s1035_s12 }
  0x65   : > { %1475 = dma.done.wait (%p1942_p8), %s285_s19, 1024  }
  0x66   : > { %1477 = vsyncadd (%p1942_p8), %s285_s19, 4294966272  ;;  %p1943_p11 = scmp.ne.s32.totalorder %s1926_s11, 0 }
  0x68   : > { %1479 = dma.done.wait (%p1943_p11), [#allocation7], 2112  }
  0x69   : > { %1481 = vsyncadd (%p1943_p11), [#allocation7], 4294965184 }
  0x6a   : > { %1483 = dma.done.wait (%p1943_p11), [#allocation10], 1024  }
  0x6b   : > { %1485 = vsyncadd (%p1943_p11), [#allocation10], 4294966272  ;;  %s326_s7 = sand.u32 1, %s1496_s22   ;;  %p1040_p0 = scmp.ne.s32.totalorder %s1516_s27, 0 }
  0x6c   : > { %s1773_s17 = sshll.u32 %s326_s7, 3 }
  0x6d   : > { %s328_s14 = scalar_lea.vmem [#allocation11], %s1773_s17  ;;  %334 = sbr.rel (%p1040_p0) target bundleno = 116 (0x74), region = 64 }
  0x72   : > { %v1543_v0 = vmov 0.0  }
  0x73   : > { %335 = vst [vmem:[#allocation2] sm:$0xff] %v1543_v0  ;;  %336 = vst [vmem:[#allocation2 + $0x8] sm:$0xff] %v1543_v0 }
  0x74 PF: > { %v339_v1 = vld [vmem:[%s1756_s8] sm:$0xff]  ;;  %v340_v2 = vld [vmem:[%s1756_s8 + $0x8] sm:$0xff]  ;;  %v341_v3 = vld [vmem:[%s1756_s8 + $0x10] sm:$0xff]  ;;  %vm475_vm0 = vcmask 1041409   ;;  %vm477_vm1 = vcmask 1042434   ;;  %vm479_vm2 = vcmask 1043459  }
  0x75   : > { %v342_v4 = vld [vmem:[%s1756_s8 + $0x18] sm:$0xff]  ;;  %v347_v5 = vunpack.c.l.bf16 %v339_v1  ;;  %v348_v6 = vunpack.c.h.bf16 %v339_v1  ;;  %v1782_v7 = vld [vmem:[%s1756_s8 + $0x20] sm:$0xff]  ;;  %v1785_v8 = vld [vmem:[%s1756_s8 + $0x28] sm:$0xff]  ;;  %v349_v10 = vunpack.c.l.bf16 %v340_v2  ;;  %v350_v11 = vunpack.c.h.bf16 %v340_v2  ;;  %p1041_p7 = scmp.ne.s32.totalorder %s1516_s27, 1 }
  0x76   : > { %v1788_v9 = vld [vmem:[%s1756_s8 + $0x30] sm:$0xff]  ;;  %v351_v12 = vunpack.c.l.bf16 %v341_v3  ;;  %v352_v13 = vunpack.c.h.bf16 %v341_v3  ;;  %v353_v14 = vunpack.c.l.bf16 %v342_v4  ;;  %v354_v15 = vunpack.c.h.bf16 %v342_v4  ;;  %v346_v47 = vld [vmem:[%s1756_s8 + $0x38] sm:$0xff] }
  0x77   : > { %v355_v16 = vunpack.c.l.bf16 %v1782_v7  ;;  %v356_v17 = vunpack.c.h.bf16 %v1782_v7  ;;  %v357_v18 = vunpack.c.l.bf16 %v1785_v8  ;;  %v358_v19 = vunpack.c.h.bf16 %v1785_v8 }
  0x78   : > { %v359_v20 = vunpack.c.l.bf16 %v1788_v9  ;;  %v363_v21 = vrot.slane %v347_v5, 4  ;;  %v369_v22 = vrot.slane %v348_v6, 4  ;;  %v375_v23 = vrot.slane %v349_v10, 4 }
  0x79   : > { %v381_v24 = vrot.slane %v350_v11, 4  ;;  %v387_v25 = vrot.slane %v351_v12, 4  ;;  %v393_v26 = vrot.slane %v352_v13, 4  ;;  %v399_v29 = vrot.slane %v353_v14, 4 }
  0x7a   : > { %v364_v27 = vadd.f32 %v363_v21, %v347_v5  ;;  %v370_v28 = vadd.f32 %v369_v22, %v348_v6  ;;  %v405_v30 = vrot.slane %v354_v15, 4  ;;  %v376_v31 = vadd.f32 %v375_v23, %v349_v10 }
  0x7b   : > { %v382_v32 = vadd.f32 %v381_v24, %v350_v11  ;;  %v388_v33 = vadd.f32 %v387_v25, %v351_v12  ;;  %v394_v34 = vadd.f32 %v393_v26, %v352_v13  ;;  %v400_v37 = vadd.f32 %v399_v29, %v353_v14 }
  0x7c   : > { %v365_v35 = vrot.slane %v364_v27, 2  ;;  %v371_v36 = vrot.slane %v370_v28, 2  ;;  %v406_v38 = vadd.f32 %v405_v30, %v354_v15  ;;  %v377_v39 = vrot.slane %v376_v31, 2 }
  0x7d   : > { %v383_v40 = vrot.slane %v382_v32, 2  ;;  %v389_v41 = vrot.slane %v388_v33, 2  ;;  %v395_v42 = vrot.slane %v394_v34, 2  ;;  %v401_v45 = vrot.slane %v400_v37, 2 }
  0x7e   : > { %v366_v43 = vadd.f32 %v365_v35, %v364_v27  ;;  %v372_v44 = vadd.f32 %v371_v36, %v370_v28  ;;  %v407_v46 = vrot.slane %v406_v38, 2  ;;  %v378_v48 = vadd.f32 %v377_v39, %v376_v31 }
  0x7f   : > { %v384_v49 = vadd.f32 %v383_v40, %v382_v32  ;;  %v390_v50 = vadd.f32 %v389_v41, %v388_v33  ;;  %v396_v51 = vadd.f32 %v395_v42, %v394_v34  ;;  %v402_v54 = vadd.f32 %v401_v45, %v400_v37 }
  0x80   : > { %v367_v52 = vrot.slane %v366_v43, 1  ;;  %v373_v53 = vrot.slane %v372_v44, 1  ;;  %v408_v55 = vadd.f32 %v407_v46, %v406_v38  ;;  %v360_v56 = vunpack.c.h.bf16 %v1788_v9 }
  0x81   : > { %v379_v57 = vrot.slane %v378_v48, 1  ;;  %v385_v58 = vrot.slane %v384_v49, 1  ;;  %v391_v59 = vrot.slane %v390_v50, 1  ;;  %v361_v60 = vunpack.c.l.bf16 %v346_v47 }
  0x82   : > { %v362_v61 = vunpack.c.h.bf16 %v346_v47  ;;  %v368_v62 = vadd.f32 %v367_v52, %v366_v43  ;;  %v397_v63 = vrot.slane %v396_v51, 1  ;;  %v1797_v0 = vadd.f32 %v373_v53, %v372_v44 }
  0x83   : > { %v380_v1 = vadd.f32 %v379_v57, %v378_v48  ;;  %v403_v2 = vrot.slane %v402_v54, 1  ;;  %v409_v3 = vrot.slane %v408_v55, 1  ;;  %v386_v4 = vadd.f32 %v385_v58, %v384_v49 }
  0x84   : > { %v392_v5 = vadd.f32 %v391_v59, %v390_v50  ;;  %v411_v6 = vrot.slane %v355_v16, 4  ;;  %v417_v7 = vrot.slane %v356_v17, 4  ;;  %v423_v10 = vrot.slane %v357_v18, 4 }
  0x85   : > { %v429_v11 = vrot.slane %v358_v19, 4  ;;  %v435_v12 = vrot.slane %v359_v20, 4  ;;  %v441_v13 = vrot.slane %v360_v56, 4  ;;  %v447_v21 = vrot.slane %v361_v60, 4 }
  0x86   : > { %v412_v14 = vadd.f32 %v411_v6, %v355_v16  ;;  %v418_v15 = vadd.f32 %v417_v7, %v356_v17  ;;  %v453_v22 = vrot.slane %v362_v61, 4  ;;  %v424_v23 = vadd.f32 %v423_v10, %v357_v18 }
  0x87   : > { %v430_v24 = vadd.f32 %v429_v11, %v358_v19  ;;  %v436_v25 = vadd.f32 %v435_v12, %v359_v20  ;;  %v442_v26 = vadd.f32 %v441_v13, %v360_v56  ;;  %v448_v29 = vadd.f32 %v447_v21, %v361_v60 }
  0x88   : > { %v413_v27 = vrot.slane %v412_v14, 2  ;;  %v419_v28 = vrot.slane %v418_v15, 2  ;;  %v454_v30 = vadd.f32 %v453_v22, %v362_v61  ;;  %v425_v16 = vrot.slane %v424_v23, 2 }
  0x89   : > { %v431_v17 = vrot.slane %v430_v24, 2  ;;  %v437_v31 = vrot.slane %v436_v25, 2  ;;  %v443_v32 = vrot.slane %v442_v26, 2  ;;  %v449_v35 = vrot.slane %v448_v29, 2 }
  0x8a   : > { %v414_v33 = vadd.f32 %v413_v27, %v412_v14  ;;  %v420_v34 = vadd.f32 %v419_v28, %v418_v15  ;;  %v455_v18 = vrot.slane %v454_v30, 2  ;;  %v426_v36 = vadd.f32 %v425_v16, %v424_v23 }
  0x8b   : > { %v432_v8 = vadd.f32 %v431_v17, %v430_v24  ;;  %v438_v19 = vadd.f32 %v437_v31, %v436_v25  ;;  %v444_v37 = vadd.f32 %v443_v32, %v442_v26  ;;  %v450_v38 = vadd.f32 %v449_v35, %v448_v29 }
  0x8c   : > { %v415_v9 = vrot.slane %v414_v33, 1  ;;  %v421_v20 = vrot.slane %v420_v34, 1  ;;  %v456_v39 = vadd.f32 %v455_v18, %v454_v30  ;;  %v427_v40 = vrot.slane %v426_v36, 1 }
  0x8d   : > { %v433_v41 = vrot.slane %v432_v8, 1  ;;  %v439_v42 = vrot.slane %v438_v19, 1  ;;  %v445_v43 = vrot.slane %v444_v37, 1  ;;  %v398_v44 = vadd.f32 %v397_v63, %v396_v51 }
  0x8e   : > { %v404_v45 = vadd.f32 %v403_v2, %v402_v54  ;;  %v451_v46 = vrot.slane %v450_v38, 1  ;;  %vm481_vm3 = vcmask 1044484   ;;  %v410_v47 = vadd.f32 %v409_v3, %v408_v55 }
  0x8f   : > { %v416_v48 = vadd.f32 %v415_v9, %v414_v33  ;;  %v457_v49 = vrot.slane %v456_v39, 1  ;;  %vm483_vm4 = vcmask 1045509   ;;  %v422_v50 = vadd.f32 %v421_v20, %v420_v34 }
  0x90   : > { %v428_v52 = vadd.f32 %v427_v40, %v426_v36  ;;  %v434_v53 = vadd.f32 %v433_v41, %v432_v8  ;;  %v476_v56 = vsel %vm475_vm0, %v380_v1, %v368_v62  ;;  %v440_v57 = vadd.f32 %v439_v42, %v438_v19  ;;  %v337_v62 = vld [vmem:[#allocation2] sm:$0xff] }
  0x91   : > { %v446_v58 = vadd.f32 %v445_v43, %v444_v37  ;;  %v478_v59 = vsel %vm477_vm1, %v392_v5, %v476_v56  ;;  %v489_v60 = vsel %vm475_vm0, %v386_v4, %v1797_v0  ;;  %v452_v51 = vadd.f32 %v451_v46, %v450_v38  ;;  %v338_v5 = vld [vmem:[#allocation2 + $0x8] sm:$0xff] }
  0x92   : > { %v480_v54 = vsel %vm479_vm2, %v404_v45, %v478_v59  ;;  %vm485_vm5 = vcmask 1046534   ;;  %v490_v55 = vsel %vm477_vm1, %v398_v44, %v489_v60  ;;  %v458_v61 = vadd.f32 %v457_v49, %v456_v39 }
  0x93   : > { %v482_v63 = vsel %vm481_vm3, %v416_v48, %v480_v54  ;;  %vm487_vm6 = vcmask 1047559   ;;  %v491_v2 = vsel %vm479_vm2, %v410_v47, %v490_v55 }
  0x94   : > { %v484_v1 = vsel %vm483_vm4, %v428_v52, %v482_v63  ;;  %v492_v3 = vsel %vm481_vm3, %v422_v50, %v491_v2 }
  0x95   : > { %v486_v6 = vsel %vm485_vm5, %v440_v57, %v484_v1  ;;  %v493_v0 = vsel %vm483_vm4, %v434_v53, %v492_v3 }
  0x96   : > { %v488_v4 = vsel %vm487_vm6, %v452_v51, %v486_v6  ;;  %v494_v7 = vsel %vm485_vm5, %v446_v58, %v493_v0  ;;  %505 = sbr.rel (%p1041_p7) target bundleno = 794 (0x31a), region = 68 }
  0x97   : > { %v495_v10 = vsel %vm487_vm6, %v458_v61, %v494_v7  ;;  %v498_v11 = vadd.f32 %v488_v4, %v337_v62 }
  0x98   : > { %v499_v12 = vadd.f32 %v495_v10, %v338_v5 }
  0x99   : > { %500 = vst [vmem:[#allocation2] sm:$0xff] %v498_v11 }
  0x9a   : > { %501 = vst [vmem:[#allocation2 + $0x8] sm:$0xff] %v499_v12 }
  0x9b   : > { %v1042_v13 = vld.sshfl [vmem:[#allocation8] sm:$0x33 pattern:$0x76325410]  ;;  %v597_v23 = vld [vmem:[%s1902_s3] sm:$0x3] }
  0x9c   : > { %v553_v21 = vcombine.high %v1042_v13, %v1042_v13  ;;  %v1544_v24 = vmov 0.0   ;;  %vm602_vm7 = vcmask 1041408   ;;  %v1274_v29 = vld [vmem:[#allocation6 + $0x78] sm:$0xff]   ;;  %vm1545_vm8 = vmmov 0   ;;  %v1276_v31 = vld [vmem:[#allocation6 + $0x70] sm:$0xff]   ;;  %v1278_v35 = vld [vmem:[#allocation6 + $0x68] sm:$0xff]  }
  0x9d   : > { %1107 = vmatprep.subr.bf16.mxu1 %v1544_v24  ;;  %v604_v27 = vsel %vm602_vm7, %v597_v23, 0  ;;  %1109 = vmatprep.mubr.msk.bf16.mxu1 %vm1545_vm8, %v1544_v24  ;;  %vm598_vm9 = vcmask 31744   ;;  %v1275_v16 = vld [vmem:[#allocation6 + $0x38] sm:$0xff]   ;;  %v1277_v34 = vld [vmem:[#allocation6 + $0x30] sm:$0xff]   ;;  %v1279_v36 = vld [vmem:[#allocation6 + $0x28] sm:$0xff]  }
  0x9e   : > { %570 = vmatprep.subr.bf16.mxu0 %v553_v21  ;;  %1108 = vmatpush3.bf16.msra.mxu1 %v604_v27  ;;  %v1280_v8 = vld [vmem:[#allocation6 + $0x60] sm:$0xff]   ;;  %v1282_v37 = vld [vmem:[#allocation6 + $0x58] sm:$0xff]   ;;  %v1284_v20 = vld [vmem:[#allocation6 + $0x50] sm:$0xff]  }
  0x9f   : > { %571 = vmatpush1.bf16.xpose.msra.mxu0 %v1042_v13  ;;  %1076 = vmatprep.subr.bf16.mxu1 %v1274_v29  ;;  %v1281_v19 = vld [vmem:[#allocation6 + $0x20] sm:$0xff]   ;;  %v1283_v9 = vld [vmem:[#allocation6 + $0x18] sm:$0xff]   ;;  %v1285_v38 = vld [vmem:[#allocation6 + $0x10] sm:$0xff]  }
  0xa0   : > { %v506_v15 = vld [vmem:[#allocation2] sm:$0xff]  ;;  %1113 = vmatprep.subr.bf16.mxu0 %v1544_v24  ;;  %v1286_v39 = vld [vmem:[#allocation6 + $0x48] sm:$0xff]   ;;  %v1288_v41 = vld [vmem:[#allocation6 + $0x40] sm:$0xff]  }
  0xa1   : > { %v507_v14 = vld [vmem:[#allocation2 + $0x8] sm:$0xff]  ;;  %v508_v26 = vmul.f32 0.0625, %v506_v15  ;;  %v1287_v40 = vld [vmem:[#allocation6 + $0x8] sm:$0xff]   ;;  %v1289_v42 = vld [vmem:[#allocation6] sm:$0xff]  }
  0xa2   : > { %v509_v22 = vmul.f32 0.0625, %v507_v14  ;;  %v1290_v43 = vld [vmem:[#allocation9 + $0x38] sm:$0xff]   ;;  %v1291_v44 = vld [vmem:[#allocation9 + $0x30] sm:$0xff]   ;;  %v1292_v45 = vld [vmem:[#allocation9 + $0x28] sm:$0xff]  }
  0xa3   : > { %v510_v28 = vpack.c.bf16 %v508_v26, %v508_v26  ;;  %v1293_v46 = vld [vmem:[#allocation9 + $0x20] sm:$0xff]   ;;  %v1294_v47 = vld [vmem:[#allocation9 + $0x18] sm:$0xff]   ;;  %v1295_v48 = vld [vmem:[#allocation9 + $0x10] sm:$0xff]  }
  0xa4   : > { %v511_v25 = vpack.c.bf16 %v509_v22, %v509_v22  ;;  %v1296_v49 = vld [vmem:[#allocation9 + $0x8] sm:$0xff]   ;;  %v1297_v50 = vld [vmem:[#allocation9] sm:$0xff]  }
  0xa5   : > { %v1060_v63 = vld [vmem:[%s1904_s5] ss:$0 sm:$0xff] }
  0xa6   : > { %588 = vmatprep.mubr.bf16.mxu0 %v511_v25 }
  0xa7   : > { %589 = vmatmul.mubr.bf16.vlgmr.msra.gmra.mxu0 %v510_v28 }
  0xa8   : > { %1129 = vmatprep.mubr.msk.bf16.mxu0 %vm1545_vm8, %v1544_v24  ;;  %1114 = vmatpush3.bf16.msra.mxu0 %v1290_v43 }
  0xa9   : > { %1115 = vmatprep.subr.bf16.mxu0 %v1544_v24 }
  0xac   : > { %1116 = vmatpush3.bf16.msra.mxu0 %v1291_v44 }
  0xad   : > { %1117 = vmatprep.subr.bf16.mxu0 %v1544_v24 }
  0xb0   : > { %1118 = vmatpush3.bf16.msra.mxu0 %v1292_v45 }
  0xb1   : > { %1119 = vmatprep.subr.bf16.mxu0 %v1544_v24 }
  0xb4   : > { %1120 = vmatpush3.bf16.msra.mxu0 %v1293_v46 }
  0xb5   : > { %1121 = vmatprep.subr.bf16.mxu0 %v1544_v24 }
  0xb8   : > { %1122 = vmatpush3.bf16.msra.mxu0 %v1294_v47 }
  0xb9   : > { %1123 = vmatprep.subr.bf16.mxu0 %v1544_v24 }
  0xbc   : > { %1124 = vmatpush3.bf16.msra.mxu0 %v1295_v48 }
  0xbd   : > { %1125 = vmatprep.subr.bf16.mxu0 %v1544_v24 }
  0xc0   : > { %1126 = vmatpush3.bf16.msra.mxu0 %v1296_v49 }
  0xc1   : > { %1127 = vmatprep.subr.bf16.mxu0 %v1544_v24 }
  0xc4   : > { %1128 = vmatpush3.bf16.msra.mxu0 %v1297_v50 }
 0x167   : > { %v590_v30 = vpop.f32.mrf.mxu0 }
 0x168   : > { %v596_v17 = vpack.c.bf16 %v590_v30, %v590_v30 }
 0x169   : > { %v592_v32 = vpop.f32.mrf.mxu0 }
 0x16a   : > { %1110 = vmatmul.mubr.msk.bf16.vlgmr.msra.gmra.mxu1 %vm598_vm9, %v596_v17 }
 0x16b   : > { %1077 = vmatpush3.bf16.msra.mxu1 %v1275_v16  ;;  %v593_v33 = vpop.f32.mrf.mxu0  ;;  %774 = vmatprep.mubr.bf16.mxu1 %v511_v25 }
 0x16c   : > { %1078 = vmatprep.subr.bf16.mxu1 %v1276_v31 }
 0x16d   : > { %v594_v18 = vpop.f32.mrf.mxu0 }
 0x16f   : > { %1079 = vmatpush3.bf16.msra.mxu1 %v1277_v34 }
 0x170   : > { %1080 = vmatprep.subr.bf16.mxu1 %v1278_v35 }
 0x173   : > { %1081 = vmatpush3.bf16.msra.mxu1 %v1279_v36 }
 0x174   : > { %1082 = vmatprep.subr.bf16.mxu1 %v1280_v8 }
 0x177   : > { %1083 = vmatpush3.bf16.msra.mxu1 %v1281_v19 }
 0x178   : > { %1084 = vmatprep.subr.bf16.mxu1 %v1282_v37 }
 0x17b   : > { %1085 = vmatpush3.bf16.msra.mxu1 %v1283_v9 }
 0x17c   : > { %1086 = vmatprep.subr.bf16.mxu1 %v1284_v20 }
 0x17f   : > { %1087 = vmatpush3.bf16.msra.mxu1 %v1285_v38 }
 0x180   : > { %1088 = vmatprep.subr.bf16.mxu1 %v1286_v39 }
 0x183   : > { %1089 = vmatpush3.bf16.msra.mxu1 %v1287_v40 }
 0x184   : > { %1090 = vmatprep.subr.bf16.mxu1 %v1288_v41 }
 0x187   : > { %1091 = vmatpush3.bf16.msra.mxu1 %v1289_v42 }
 0x18a   : > { %775 = vmatmul.mubr.bf16.vlgmr.msra.gmra.mxu1 %v510_v28 }
 0x22a   : > { %v640_v52 = vpop.f32.mrf.mxu1 }
 0x22c   : > { %v1111_v53 = vpop.f32.mrf.mxu1 }
 0x22e   : > { %v643_v56 = vpop.f32.mrf.mxu1 }
 0x230   : > { %v1112_v57 = vpop.f32.mrf.mxu1 }
 0x24a   : > { %v1092_v58 = vpop.f32.mrf.mxu1 }
 0x24c   : > { %v1093_v59 = vpop.f32.mrf.mxu1 }
 0x24d   : > { %v1094_v60 = vadd.f32 %v1093_v59, %v1092_v58 }
 0x24e   : > { %v1095_v51 = vpop.f32.mrf.mxu1 }
 0x24f   : > { %v777_v54 = vadd.f32 %v1094_v60, %v640_v52 }
 0x250   : > { %v1096_v55 = vpop.f32.mrf.mxu1 }
 0x251   : > { %v782_v61 = vpack.c.bf16 %v777_v54, %v777_v54 }
 0x253   : > { %1130 = vmatmul.mubr.bf16.vlgmr.msra.gmra.mxu0 %v782_v61 }
 0x313   : > { %v888_v2 = vpop.f32.mrf.mxu0 }
 0x314   : > { %v889_v62 = vadd.f32 %v1060_v63, %v888_v2 }
 0x315   : > { %v1131_v1 = vpop.f32.mrf.mxu0 }
 0x316   : > { %894 = vst [vmem:[%s328_s14] sm:$0xff] %v889_v62 }
 0x317   : > { %v891_v3 = vpop.f32.mrf.mxu0 }
 0x319   : > { %v1132_v5 = vpop.f32.mrf.mxu0 }
 0x31a PF: > { %s1944_s16 = sld [smem:[#allocation19_spill]]  ;;  %s1070_s21 = sshll.u32 %s1520_s28, 7 }
 0x31b   : > { %s1945_s4 = sld [smem:[#allocation25_spill]]  ;;  %s909_s6 = sshll.u32 %s328_s14, 4  ;;  %s910_s6 = int_to_ptr.vmem [resolvable:$true] %s909_s6 }
 0x31c   : > { %s896_s29 = scalar_lea.sflag [#allocation5], %s326_s7  ;;  %s1404_s9 = scalar_lea.vmem %s910_s6, 128 }
 0x31d   : > { %p1405_p5 = scmp.ne.s32.totalorder %s910_s6, %s1404_s9  ;;  %s1546_s12 = smov [#allocation11]  }
 0x31e   : > { %s1408_s19 = sshll.u32 %s1546_s12, 4  ;;  %s1409_s19 = int_to_ptr.vmem [resolvable:$false] %s1408_s19 }
 0x31f   : > { %s1410_s8 = scalar_lea.vmem %s1409_s19, 256  ;;  %p1411_p13 = scmp.lt.s32.totalorder %s910_s6, %s1409_s19 }
 0x320   : > { %p1946_p12 = scmp.ne.s32.totalorder %s1944_s16, 0  ;;  %p1412_p1 = scmp.lt.s32.totalorder %s1410_s8, %s1404_s9 }
 0x321   : > { %s907_s2 = scalar_lea.hbm %s1945_s4, %s1070_s21 }
 0x322   : > { %p1406_p10 = pnand %p1405_p5, %p1946_p12  ;;  %p1413_p4 = por %p1412_p1, %p1411_p13 }
 0x324   : > { %p1407_p3 = pneg %p1406_p10 }
 0x326   : > { %p1414_p6 = pnand %p1413_p4, %p1407_p3 }
 0x328   : > { %1417 = shalt.err (!%p1414_p6)
}
 0x329   : > { %s1418_s28 = scalar_lea.hbm %s907_s2, 128  ;;  %s1422_s14 = scalar_lea.hbm %s1945_s4, 256 }
 0x32a   : > { %p1419_p2 = scmp.ne.s32.totalorder %s907_s2, %s1418_s28  ;;  %p1423_p11 = scmp.lt.s32.totalorder %s907_s2, %s1945_s4 }
 0x32b   : > { %p1424_p0 = scmp.lt.s32.totalorder %s1422_s14, %s1418_s28 }
 0x32c   : > { %p1420_p9 = pnand %p1419_p2, %p1946_p12 }
 0x32d   : > { %p1425_p7 = por %p1424_p0, %p1423_p11 }
 0x32e   : > { %p1421_p8 = pneg %p1420_p9 }
 0x330   : > { %p1426_p5 = pnand %p1425_p7, %p1421_p8 }
 0x332   : > { %1429 = shalt.err (!%p1426_p5)
}
 0x333   : > { %1147 = dma.vmem_to_hbm [thread:$0]  (%p1946_p12), %s910_s6, 128, %s907_s2, %s896_s29  }
 0x334 PF: > { %s1947_s27 = sld [smem:[#allocation18_spill]] }
 0x335   : > { %s1948_s13 = sld [smem:[#allocation16_spill]] }
 0x336   : > { %s1949_s21 = sld [smem:[#allocation20_spill]] }
 0x33a   : > { %p1174_p10 = scmp.ge.s32.totalorder %s1947_s27, 2 }
 0x33b   : > { %s921_s20 = sand.u32 1, %s1948_s13  }
 0x33c   : > { %p1950_p3 = scmp.ne.s32.totalorder %s1949_s21, 0  ;;  %s922_s1 = scalar_lea.sflag [#allocation5], %s921_s20 }
 0x33e   : > { %p1164_p13 = pnand %p1174_p10, %p1950_p3 }
 0x340   : > { %p1165_p1 = pneg %p1164_p13 }
 0x342   : > { %1487 = dma.done.wait (%p1165_p1), %s922_s1, 128  }
 0x343   : > { %1489 = vsyncadd (%p1165_p1), %s922_s1, 4294967168  ;;  %s24_s7 = sadd.s32 1, %s1947_s27   ;;  %s1951_s27 = sld [smem:[#allocation17_spill]] }
 0x344   : > { %p21_p4 = scmp.ge.s32.totalorder %s24_s7, 6   ;;  %s1952_s29 = sld [smem:[#allocation21_spill]] }
 0x345   : > { %s1953_s21 = smov %s1496_s22  ;;  %s1954_s22 = smov %s1500_s23 }
 0x346   : > { %s1955_s23 = smov %s1738_s10  ;;  %s1956_s24 = smov %s1508_s25 }
 0x347   : > { %s1957_s25 = smov %s1512_s26  ;;  %s1958_s26 = smov %s1743_s15 }
 0x348   : > { %s1959_s28 = smov %s1528_s30  ;;  %s1960_s30 = smov %s1966_s18 }
 0x349   :  { %23 = sbr.rel (!%p21_p4) target bundleno = 16 (0x10), region = 109 }
 0x34e   :  { %927 = vsyncpa [#allocation4], 1 }
 0x34f   :  { %929 = vsyncpa [#allocation4 + $0x1], 1 }
 0x350   :  { %930 = vsyncpa [#allocation7], 1 }
 0x351   :  { %931 = vsyncpa [#allocation10], 1 }
 0x352   :  { %932 = vsyncpa [#allocation5], 1 }
 0x353   :  { %934 = vsyncpa [#allocation5 + $0x1], 1 }

</bundles_post_ra>
